<compile_context>
chip_gen: v5e
topology: v5e:2x2
jax: 0.10.0
libtpu: 0.0.40
codegen_flags: <defaults>
</compile_context>

<pallas_src>
import functools

import jax
import jax.numpy as jnp
from jax.experimental import pallas as pl
from jax.experimental.pallas import tpu as pltpu


def _round_up(x, m):
    return ((x + m - 1) // m) * m


def affinity_kernel(src_ref, trj_ref, m_ref, out_ref):
    # P = src @ M : bf16 x bf16 -> f32 accumulation on the MXU.
    p = jnp.dot(src_ref[...], m_ref[...], preferred_element_type=jnp.float32)
    t = trj_ref[...].astype(jnp.float32)
    # affinity = sum(P * trj, axis=-1)        (VPU product + XLU lane reduce)
    out_ref[...] = jnp.sum(p * t, axis=-1, keepdims=True)


@functools.partial(jax.jit, static_argnames=("block_rows",))
def affinity_net(feat_src, feat_trj, w_src, w_trj, *, block_rows=1024):
    """feat_*: [B, nz_feat];  w_*: [nz_af, nz_feat] (PyTorch Linear layout).

    Returns affinity: [B] float32 (== sum((x @ Ws^T) * (y @ Wt^T), dim=-1)).
    """
    B, nz_feat = feat_src.shape

    # Fused encoder matrix: M = Ws^T @ Wt  -> [nz_feat, nz_feat].
    m = (jnp.asarray(w_src, jnp.float32).T
         @ jnp.asarray(w_trj, jnp.float32)).astype(jnp.bfloat16)

    src = jnp.asarray(feat_src, jnp.bfloat16)
    trj = jnp.asarray(feat_trj, jnp.bfloat16)

    # Row tile: large enough to pipeline, but never exceeding the (padded) batch.
    tb = min(block_rows, _round_up(B, 8))
    b_pad = _round_up(B, tb)
    if b_pad != B:
        pad = ((0, b_pad - B), (0, 0))
        src = jnp.pad(src, pad)
        trj = jnp.pad(trj, pad)
    num_tiles = b_pad // tb

    bytes_accessed = 2 * b_pad * nz_feat * 2 + nz_feat * nz_feat * 2 + b_pad * 4
    flops = 2 * b_pad * nz_feat * nz_feat + 2 * b_pad * nz_feat

    out = pl.pallas_call(
        affinity_kernel,
        out_shape=jax.ShapeDtypeStruct((b_pad, 1), jnp.float32),
        grid_spec=pltpu.PrefetchScalarGridSpec(
            num_scalar_prefetch=0,
            grid=(num_tiles,),
            in_specs=[
                pl.BlockSpec((tb, nz_feat), lambda i: (i, 0)),        # src tile
                pl.BlockSpec((tb, nz_feat), lambda i: (i, 0)),        # trj tile
                pl.BlockSpec((nz_feat, nz_feat), lambda i: (0, 0)),   # M resident
            ],
            out_specs=pl.BlockSpec((tb, 1), lambda i: (i, 0)),
        ),
        compiler_params=pltpu.CompilerParams(
            dimension_semantics=("parallel",),
            vmem_limit_bytes=32 * 1024 * 1024,
        ),
        cost_estimate=pl.CostEstimate(
            flops=int(flops),
            transcendentals=0,
            bytes_accessed=int(bytes_accessed),
        ),
    )(src, trj, m)

    return out[:B, 0]  # [B], matching torch.sum(..., dim=-1)


if __name__ == "__main__":
    # Small shapes consistent with the module: batch=8, nz_feat=32, nz_af=16.
    B, NZ_FEAT, NZ_AF = 8, 32, 16

    key = jax.random.PRNGKey(0)
    k1, k2, k3, k4 = jax.random.split(key, 4)

    feat_src = jax.random.normal(k1, (B, NZ_FEAT), dtype=jnp.float32)
    feat_trj = jax.random.normal(k2, (B, NZ_FEAT), dtype=jnp.float32)

    # nn.Linear(nz_feat, nz_af, bias=False) -> weight shape [nz_af, nz_feat].
    bound = 1.0 / jnp.sqrt(NZ_FEAT)
    w_src = jax.random.uniform(k3, (NZ_AF, NZ_FEAT), jnp.float32, -bound, bound)
    w_trj = jax.random.uniform(k4, (NZ_AF, NZ_FEAT), jnp.float32, -bound, bound)

    affinity = jax.block_until_ready(affinity_net(feat_src, feat_trj, w_src, w_trj))

    # Full-precision reference (PyTorch semantics).
    ref_f32 = jnp.sum((feat_src @ w_src.T) * (feat_trj @ w_trj.T), axis=-1)
    # Quantization-matched reference (same bf16 inputs / fused M as the kernel).
    m_bf = (w_src.T @ w_trj).astype(jnp.bfloat16).astype(jnp.float32)
    src_bf = feat_src.astype(jnp.bfloat16).astype(jnp.float32)
    trj_bf = feat_trj.astype(jnp.bfloat16).astype(jnp.float32)
    ref_bf = jnp.sum((src_bf @ m_bf) * trj_bf, axis=-1)

    assert affinity.shape == (B,)
    assert jnp.allclose(affinity, ref_bf, atol=2e-3, rtol=2e-3), "mismatch vs bf16-matched ref"
    assert jnp.allclose(affinity, ref_f32, atol=1e-1, rtol=1e-1), "mismatch vs f32 ref"

    # Exercise the multi-tile grid + ragged-batch padding path (4 tiles of 64).
    B2 = 200
    k5, k6 = jax.random.split(k1, 2)
    fs2 = jax.random.normal(k5, (B2, NZ_FEAT), dtype=jnp.float32)
    ft2 = jax.random.normal(k6, (B2, NZ_FEAT), dtype=jnp.float32)
    aff2 = jax.block_until_ready(
        affinity_net(fs2, ft2, w_src, w_trj, block_rows=64))
    ref2 = jnp.sum((fs2 @ w_src.T) * (ft2 @ w_trj.T), axis=-1)
    assert aff2.shape == (B2,)
    assert jnp.allclose(aff2, ref2, atol=1e-1, rtol=1e-1), "multi-tile mismatch"

    print("KERNEL_OK")
</pallas_src>

<mosaic_0001>
module attributes {stable_mosaic.version = 11 : i64} {
  func.func @affinity_kernel(%arg0: i32, %arg1: memref<8x32xbf16, #tpu.memory_space<vmem>>, %arg2: memref<8x32xbf16, #tpu.memory_space<vmem>>, %arg3: memref<32x32xbf16, #tpu.memory_space<vmem>>, %arg4: memref<8x1xf32, #tpu.memory_space<vmem>>) attributes {dimension_semantics = [#tpu.dimension_semantics<parallel>], iteration_bounds = array<i64: 1>, scalar_prefetch = 0 : i64, scratch_operands = 0 : i64, tpu.core_type = #tpu.core_type<tc>, window_params = [{transform_indices = @transform_0, window_bounds = array<i64: 8, 32>}, {transform_indices = @transform_1, window_bounds = array<i64: 8, 32>}, {pipeline_mode = #tpu.pipeline_mode<synchronous>, transform_indices = @transform_2, window_bounds = array<i64: 32, 32>}, {transform_indices = @transform_3, window_bounds = array<i64: 8, 1>}]} {
    %c0 = arith.constant 0 : index
    %c0_0 = arith.constant 0 : index
    %0 = vector.load %arg1[%c0, %c0_0] : memref<8x32xbf16, #tpu.memory_space<vmem>>, vector<8x32xbf16>
    %c0_1 = arith.constant 0 : index
    %c0_2 = arith.constant 0 : index
    %1 = vector.load %arg3[%c0_1, %c0_2] : memref<32x32xbf16, #tpu.memory_space<vmem>>, vector<32x32xbf16>
    %cst = arith.constant dense<0.000000e+00> : vector<8x32xf32>
    %2 = tpu.matmul %0, %1, %cst {dimension_numbers = #tpu.dot_dimension_numbers<[1], [0], [0], [1], [0, 0, 1, 1], [], []>} : vector<8x32xbf16>, vector<32x32xbf16>, vector<8x32xf32> -> vector<8x32xf32>
    %c0_3 = arith.constant 0 : index
    %c0_4 = arith.constant 0 : index
    %3 = vector.load %arg2[%c0_3, %c0_4] : memref<8x32xbf16, #tpu.memory_space<vmem>>, vector<8x32xbf16>
    %4 = arith.extf %3 : vector<8x32xbf16> to vector<8x32xf32>
    %5 = arith.mulf %2, %4 : vector<8x32xf32>
    %cst_5 = arith.constant dense<0.000000e+00> : vector<8xf32>
    %6 = vector.multi_reduction <add>, %5, %cst_5 [1] : vector<8x32xf32> to vector<8xf32>
    %7 = vector.shape_cast %6 : vector<8xf32> to vector<8x1xf32>
    %c0_6 = arith.constant 0 : index
    %c0_7 = arith.constant 0 : index
    %8 = vector.load %arg4[%c0_6, %c0_7] : memref<8x1xf32, #tpu.memory_space<vmem>>, vector<8x1xf32>
    tpu.vector_store %arg4[%c0_6, %c0_7], %7 {strides = array<i32>} : memref<8x1xf32, #tpu.memory_space<vmem>>, vector<8x1xf32>,
    return
  }
  func.func @transform_0(%arg0: i32) -> (i32, i32) {
    %c0_i32 = arith.constant 0 : i32
    %c0_i32_0 = arith.constant 0 : i32
    return %arg0, %c0_i32 : i32, i32
  }
  func.func @transform_1(%arg0: i32) -> (i32, i32) {
    %c0_i32 = arith.constant 0 : i32
    %c0_i32_0 = arith.constant 0 : i32
    return %arg0, %c0_i32 : i32, i32
  }
  func.func @transform_2(%arg0: i32) -> (i32, i32) {
    %c0_i32 = arith.constant 0 : i32
    %c0_i32_0 = arith.constant 0 : i32
    %c0_i32_1 = arith.constant 0 : i32
    return %c0_i32, %c0_i32_0 : i32, i32
  }
  func.func @transform_3(%arg0: i32) -> (i32, i32) {
    %c0_i32 = arith.constant 0 : i32
    %c0_i32_0 = arith.constant 0 : i32
    return %arg0, %c0_i32 : i32, i32
  }
}

</mosaic_0001>

<bundles_post_ra>
// kernel: affinity_net.1
= control target key start
LH: loop header
LB: loop body
LE: loop exit
PB: predicated region body
PF: predicated region fallthrough
CT: control target
= control target key end

     0   :  { %vm32_vm0 = vcmask 261120   ;;  %vm55_vm1 = vcmask 7168   ;;  %s107_s2 = inlined_call_operand.vmem [shape: bf16[32,32], index: 2, kind: input, shape index: {}]   ;;  %s108_s0 = inlined_call_operand.vmem [shape: bf16[8,32], index: 0, kind: input, shape index: {}]   ;;  %s109_s1 = inlined_call_operand.vmem [shape: bf16[8,32], index: 1, kind: input, shape index: {}]   ;;  %s110_s3 = inlined_call_operand.vmem [shape: f32[8,1], index: 3, kind: output, shape index: {}]  }
   0x1   :  { %v71_v0 = vld [vmem:[%s107_s2 + $0x8] sm:$0xff]  ;;  %v70_v1 = vld [vmem:[%s107_s2] sm:$0xff] }
   0x2   :  { %42 = vmatpush.bf16.msra.mxu0 %v71_v0  ;;  %v15_v2 = vld [vmem:[%s108_s0] sm:$0xf] }
   0x3   :  { %v49_v3 = vld [vmem:[%s109_s1] sm:$0xf] }
   0x4   :  { %v50_v4 = vunpack.c.l.bf16 %v49_v3 }
   0x6   :  { %43 = vmatpush.bf16.msra.mxu0 %v70_v1 }
   0x9   :  { %69 = vmatmul.msk.bf16.vlgmr.msra.gmra.mxu0 %vm32_vm0, %v15_v2 }
  0x86   :  { %v45_v5 = vpop.f32.mrf.mxu0 }
  0x87   :  { %v51_v6 = vmul.f32 %v50_v4, %v45_v5 }
  0x89   :  { %v52_v7 = vsel %vm32_vm0, %v51_v6, 0.0 }
  0x8a   :  { %53 = vadd.xlane.f32.xlu0 %v52_v7 }
  0x8e   :  { %v47_v8 = vpop.f32.mrf.mxu0 }
  0xfd   :  { %v54_v9 = vpop.xlane.xlu0 %53 }
  0xfe   :  { %56 = vst.msk [vmem:[%s110_s3] sm:$0xff] %vm55_vm1, %v54_v9 }

</bundles_post_ra>
